<compile_context>
chip_gen: v7x
topology: tpu7x:2x2x1
jax: 0.10.0
libtpu: 0.0.40
codegen_flags: <defaults>
</compile_context>

<pallas_src>
import functools
import math

import jax
import jax.numpy as jnp
from jax.experimental import pallas as pl
from jax.experimental.pallas import tpu as pltpu

_BN_EPS = 1e-5
_LANE = 128


def _round_up(x, m):
    return (x + m - 1) // m * m


def _vmem_capacity():
    try:
        return int(pltpu.get_tpu_info().vmem_capacity_bytes)
    except Exception:
        return 64 << 20          # conservative fallback (v7x per-TC VMEM)


# ----------------------------------------------------------------------------
# Pallas kernel: Q shifted MXU matmuls (conv) + folded-BN affine + SiLU
# ----------------------------------------------------------------------------
def _conv_bn_silu_kernel(x_ref, w_ref, scale_ref, bias_ref, o_ref, *,
                         offs, chunk, nchunks):
    # x_ref:     (R, C)       bf16  halo'd strip, spatially flattened row-major
    # w_ref:     (Q, C, TCO)  bf16  Q = len(offs) taps, contraction width C
    # scale_ref: (1, TCO)     f32   folded BatchNorm scale
    # bias_ref:  (1, TCO)     f32   folded BatchNorm bias
    # o_ref:     (M, TCO)     bf16  M = nchunks * chunk output positions
    tco = o_ref.shape[-1]
    # Hoist the per-channel affine broadcast out of the chunk loop.
    scale = jnp.broadcast_to(scale_ref[...], (chunk, tco))
    bias = jnp.broadcast_to(bias_ref[...], (chunk, tco))

    def do_chunk(start):
        acc = jnp.zeros((chunk, tco), dtype=jnp.float32)
        for q, off in enumerate(offs):
            xs = x_ref[pl.ds(start + off, chunk), :]          # (chunk, C) bf16
            acc = acc + jnp.dot(xs, w_ref[q],
                                preferred_element_type=jnp.float32)
        z = acc * scale + bias                                # folded BN (f32)
        sig = pl.reciprocal(1.0 + jnp.exp(-z), approx=True)   # EUP exp + rcp
        o_ref[pl.ds(start, chunk), :] = (z * sig).astype(o_ref.dtype)

    if nchunks <= 8:
        for c in range(nchunks):                              # static offsets
            do_chunk(c * chunk)
    else:
        def body(c, carry):
            do_chunk(pl.multiple_of(c * chunk, 16))
            return carry
        jax.lax.fori_loop(0, nchunks, body, 0)


# ----------------------------------------------------------------------------
# Tiling heuristic: row tile from a generation-aware VMEM budget
# ----------------------------------------------------------------------------
def _choose_row_tile(H, Wrow, C, TCO, Q, p, vmem_cap):
    budget = min(32 << 20, (vmem_cap * 2) // 5)        # ~0.4x VMEM, <= 32 MiB
    Cl = _round_up(C, _LANE)                           # VMEM lane padding of strip
    per_row = 2 * Wrow * Cl * 2 + 2 * Wrow * TCO * 2   # strip + out tile, x2 bufs, bf16
    fixed = 2 * Q * C * TCO * 2                        # resident weight, x2 bufs
    fixed += 2 * 2 * p * Wrow * Cl * 2                 # row halos, x2 bufs
    fixed += 6 << 20                                   # f32 acc/temps + Mosaic internal
    th = max(8, (budget - fixed) // per_row)
    th = int(min(th, H))
    # Chunk rows so each in-kernel accumulation covers ~512 flat output rows.
    rc = max(1, min(th, 512 // Wrow if Wrow <= 512 else 1))
    if th >= H:
        th = H
        while H % rc:                                  # rc must divide TH
            rc -= 1
    else:
        th = max(rc, th // rc * rc)
    return int(th), int(rc)


# ----------------------------------------------------------------------------
# Wrapper: one Conv(c1, c2, k, s=1) block == conv2d(no bias) -> BN -> SiLU
# ----------------------------------------------------------------------------
def conv_bn_silu(x_nhwc, w, scale, bias, *, interpret=False):
    """x_nhwc: (N, H, W, Cin)
       w:      (K, K, Cin, Cout)   (stride 1, pad K//2, dilation 1, groups 1)
       scale, bias: (Cout,)        (folded BatchNorm affine)
       returns (N, H, W, Cout) bfloat16
    """
    N, H, W, Cin = x_nhwc.shape
    K = w.shape[0]
    Cout = w.shape[-1]
    assert w.shape == (K, K, Cin, Cout)
    assert K % 2 == 1, "even kernel sizes not implemented"
    p = K // 2

    Cin_p = _round_up(Cin, 8)
    Cout_p = _round_up(Cout, _LANE)

    # Cout tiling: keep the whole weight resident (fetched once, constant
    # index_map) unless the layer is very wide.
    if Cout_p <= 1024:
        TCO = Cout_p
    elif Cout_p % 256 == 0:
        TCO = 256
    else:
        TCO = 128
    nCO = Cout_p // TCO

    # Small-Cin layers: fold kj into the contraction (K matmuls of width
    # K*Cin_p, all offsets ki*Wrow -> sublane aligned).
    fold = Cin_p <= 64
    if fold:
        Wrow = _round_up(W, 16)
        C = K * Cin_p
        Q = K
    else:
        Wrow = _round_up(W + 2 * p, 16)
        C = Cin_p
        Q = K * K

    vmem_cap = _vmem_capacity()
    TH, rc = _choose_row_tile(H, Wrow, C, TCO, Q, p, vmem_cap)
    nT = pl.cdiv(H, TH)          # NOTE(v7x): with N==1 an even nT feeds both TCs
    Hpad = nT * TH
    THp = TH + 2 * p
    M = TH * Wrow                # flat output rows per tile (multiple of 16)
    chunk = rc * Wrow
    nchunks = TH // rc
    R = _round_up(THp * Wrow + (0 if fold else K - 1), 16)

    # ---- activation strips: fused bf16 cast + pad; NO K*K im2col ---------------
    xb = x_nhwc.astype(jnp.bfloat16)
    if fold:
        xb = jnp.pad(xb, ((0, 0), (p, p + Hpad - H), (p, p), (0, Cin_p - Cin)))
        if K > 1:   # width-only gather: channel dim becomes K*Cin_p
            xb = jnp.concatenate([xb[:, :, kj:kj + W, :] for kj in range(K)], axis=-1)
        if Wrow > W:
            xb = jnp.pad(xb, ((0, 0), (0, 0), (0, Wrow - W), (0, 0)))
    else:
        xb = jnp.pad(xb, ((0, 0), (p, p + Hpad - H), (p, Wrow - W - p), (0, Cin_p - Cin)))
    if nT == 1:
        strips = xb.reshape(N, 1, THp * Wrow, C)
    else:
        strips = jnp.stack([xb[:, t * TH:t * TH + THp] for t in range(nT)], axis=1)
        strips = strips.reshape(N, nT, THp * Wrow, C)
    if R > THp * Wrow:
        strips = jnp.pad(strips, ((0, 0), (0, 0), (0, R - THp * Wrow), (0, 0)))

    # ---- weight + folded-BN params --------------------------------------------
    w_p = jnp.pad(w, ((0, 0), (0, 0), (0, Cin_p - Cin),
                      (0, Cout_p - Cout))).astype(jnp.bfloat16)
    if fold:
        w_k = w_p.reshape(K, K * Cin_p, Cout_p)               # [ki, kj*Cin_p+ci, co]
        offs = tuple(ki * Wrow for ki in range(K))            # all 16-aligned
    else:
        w_k = w_p.reshape(K * K, Cin_p, Cout_p)
        offs = tuple(ki * Wrow + kj for ki in range(K) for kj in range(K))
    scale_p = jnp.pad(scale.reshape(1, Cout).astype(jnp.float32),
                      ((0, 0), (0, Cout_p - Cout)))
    bias_p = jnp.pad(bias.reshape(1, Cout).astype(jnp.float32),
                     ((0, 0), (0, Cout_p - Cout)))

    kernel = functools.partial(_conv_bn_silu_kernel,
                               offs=offs, chunk=chunk, nchunks=nchunks)

    est_vmem = (2 * R * _round_up(C, _LANE) * 2 + 2 * M * TCO * 2
                + 2 * Q * C * TCO * 2 + 2 * chunk * TCO * 4 + (4 << 20))
    vmem_limit = int(min(vmem_cap - (2 << 20), max(32 << 20, est_vmem * 3 // 2)))

    flops = 2 * N * H * W * K * K * Cin * Cout               # unpadded work
    bytes_accessed = (int(strips.size) * 2 + int(w_k.size) * 2
                      + N * nT * M * Cout_p * 2)

    out = pl.pallas_call(
        kernel,
        out_shape=jax.ShapeDtypeStruct((N, nT, M, Cout_p), jnp.bfloat16),
        grid=(N, nCO, nT),
        in_specs=[
            pl.BlockSpec((None, None, R, C), lambda n, j, t: (n, t, 0, 0)),
            pl.BlockSpec((Q, C, TCO), lambda n, j, t: (0, 0, j)),    # resident when nCO==1
            pl.BlockSpec((1, TCO), lambda n, j, t: (0, j)),
            pl.BlockSpec((1, TCO), lambda n, j, t: (0, j)),
        ],
        out_specs=pl.BlockSpec((None, None, M, TCO), lambda n, j, t: (n, t, 0, j)),
        compiler_params=pltpu.CompilerParams(
            dimension_semantics=("parallel", "parallel", "parallel"),
            vmem_limit_bytes=vmem_limit),
        cost_estimate=pl.CostEstimate(
            flops=flops,
            transcendentals=2 * N * H * W * Cout,
            bytes_accessed=bytes_accessed),
        interpret=interpret,
    )(strips, w_k, scale_p, bias_p)

    # ---- un-tile: drop padded width columns, padded rows, padded channels ------
    out = out.reshape(N, nT, TH, Wrow, Cout_p)[:, :, :, :W, :Cout]
    out = out.reshape(N, Hpad, W, Cout)[:, :H]
    return out


# ----------------------------------------------------------------------------
# Parameters (mirrors the PyTorch module: Conv2d weight + BatchNorm2d stats)
# ----------------------------------------------------------------------------
def make_conv_params(key, c1, c2, k=1):
    kw, kg, kb, km, kv = jax.random.split(key, 5)
    w = jax.random.normal(kw, (k, k, c1, c2), jnp.float32) / math.sqrt(k * k * c1)
    gamma = 1.0 + 0.1 * jax.random.normal(kg, (c2,), jnp.float32)
    beta = 0.1 * jax.random.normal(kb, (c2,), jnp.float32)
    mean = 0.1 * jax.random.normal(km, (c2,), jnp.float32)
    var = jnp.abs(1.0 + 0.1 * jax.random.normal(kv, (c2,), jnp.float32))
    return dict(w=w, gamma=gamma, beta=beta, mean=mean, var=var)


def fold_bn(params):
    scale = params["gamma"] / jnp.sqrt(params["var"] + _BN_EPS)
    bias = params["beta"] - params["mean"] * scale
    return scale, bias


def conv_forward(x_nchw, params):
    """Conv module forward: SiLU(BN(conv2d(x))), NCHW in / NCHW out (f32)."""
    scale, bias = fold_bn(params)
    x_nhwc = jnp.transpose(x_nchw, (0, 2, 3, 1))               # NCHW -> NHWC
    y = conv_bn_silu(x_nhwc, params["w"], scale, bias)         # bf16 NHWC
    # f32 cast fuses into the layout transpose (no extra HBM pass).
    return jnp.transpose(y, (0, 3, 1, 2)).astype(jnp.float32)


# ----------------------------------------------------------------------------
# Pure-JAX reference (sanity check)
# ----------------------------------------------------------------------------
def _ref_conv(x_nchw, params):
    z = jax.lax.conv_general_dilated(
        x_nchw, params["w"], window_strides=(1, 1), padding="SAME",
        dimension_numbers=("NCHW", "HWIO", "NCHW"),
        precision=jax.lax.Precision.HIGHEST)
    scale, bias = fold_bn(params)
    z = z * scale.reshape(1, -1, 1, 1) + bias.reshape(1, -1, 1, 1)
    return z * jax.nn.sigmoid(z)


if __name__ == "__main__":
    key = jax.random.PRNGKey(0)
    kx, kp1, kp2, kx3, kp3 = jax.random.split(key, 5)

    # Case 1: 3x3 Conv, small Cin -> folded-kj path (K matmuls, K*Cin contraction).
    N, C1, H, W = 2, 4, 16, 16
    x = jax.random.normal(kx, (N, C1, H, W), jnp.float32)
    p3 = make_conv_params(kp1, C1, 8, k=3)
    y3 = conv_forward(x, p3)
    jax.block_until_ready(y3)
    r3 = _ref_conv(x, p3)
    assert y3.shape == (N, 8, H, W)
    assert jnp.allclose(y3, r3, atol=5e-2, rtol=5e-2), "k=3 (small Cin) mismatch"

    # Case 2: 1x1 Conv (the module's default k=1).
    p1 = make_conv_params(kp2, C1, 16, k=1)
    y1 = conv_forward(x, p1)
    jax.block_until_ready(y1)
    r1 = _ref_conv(x, p1)
    assert y1.shape == (N, 16, H, W)
    assert jnp.allclose(y1, r1, atol=5e-2, rtol=5e-2), "k=1 mismatch"

    # Case 3: 3x3 Conv with wide Cin -> unfolded path (K*K matmuls).
    x3 = jax.random.normal(kx3, (2, 128, 8, 8), jnp.float32)
    pw = make_conv_params(kp3, 128, 128, k=3)
    yw = conv_forward(x3, pw)
    jax.block_until_ready(yw)
    rw = _ref_conv(x3, pw)
    assert yw.shape == (2, 128, 8, 8)
    assert jnp.allclose(yw, rw, atol=5e-2, rtol=5e-2), "k=3 (wide Cin) mismatch"

    print("KERNEL_OK")
</pallas_src>

<mosaic_0001>
module attributes {stable_mosaic.version = 11 : i64} {
  func.func @_conv_bn_silu_kernel(%arg0: i32, %arg1: i32, %arg2: i32, %arg3: memref<1x1x288x24xbf16, #tpu.memory_space<vmem>>, %arg4: memref<3x24x128xbf16, #tpu.memory_space<vmem>>, %arg5: memref<1x128xf32, #tpu.memory_space<vmem>>, %arg6: memref<1x128xf32, #tpu.memory_space<vmem>>, %arg7: memref<1x1x256x128xbf16, #tpu.memory_space<vmem>>) attributes {dimension_semantics = [#tpu.dimension_semantics<parallel>, #tpu.dimension_semantics<parallel>, #tpu.dimension_semantics<parallel>], iteration_bounds = array<i64: 2, 1, 1>, scalar_prefetch = 0 : i64, scratch_operands = 0 : i64, tpu.core_type = #tpu.core_type<tc>, window_params = [{transform_indices = @transform_0, window_bounds = array<i64: 1, 1, 288, 24>}, {transform_indices = @transform_1, window_bounds = array<i64: 3, 24, 128>}, {transform_indices = @transform_2, window_bounds = array<i64: 1, 128>}, {transform_indices = @transform_3, window_bounds = array<i64: 1, 128>}, {transform_indices = @transform_4, window_bounds = array<i64: 1, 1, 256, 128>}]} {
    %c0 = arith.constant 0 : index
    %c0_0 = arith.constant 0 : index
    %0 = vector.load %arg5[%c0, %c0_0] : memref<1x128xf32, #tpu.memory_space<vmem>>, vector<1x128xf32>
    %1 = vector.shape_cast %0 : vector<1x128xf32> to vector<1x128xf32>
    %2 = vector.broadcast %1 : vector<1x128xf32> to vector<256x128xf32>
    %c0_1 = arith.constant 0 : index
    %c0_2 = arith.constant 0 : index
    %3 = vector.load %arg6[%c0_1, %c0_2] : memref<1x128xf32, #tpu.memory_space<vmem>>, vector<1x128xf32>
    %4 = vector.shape_cast %3 : vector<1x128xf32> to vector<1x128xf32>
    %5 = vector.broadcast %4 : vector<1x128xf32> to vector<256x128xf32>
    %cst = arith.constant 0.000000e+00 : f32
    %6 = vector.broadcast %cst : f32 to vector<256x128xf32>
    %c0_3 = arith.constant 0 : index
    %c0_4 = arith.constant 0 : index
    %c0_5 = arith.constant 0 : index
    %c0_6 = arith.constant 0 : index
    %7 = vector.load %arg3[%c0_3, %c0_4, %c0_5, %c0_6] : memref<1x1x288x24xbf16, #tpu.memory_space<vmem>>, vector<1x1x256x24xbf16>
    %8 = vector.shape_cast %7 : vector<1x1x256x24xbf16> to vector<256x24xbf16>
    %c0_7 = arith.constant 0 : index
    %c0_8 = arith.constant 0 : index
    %c0_9 = arith.constant 0 : index
    %9 = vector.load %arg4[%c0_7, %c0_8, %c0_9] : memref<3x24x128xbf16, #tpu.memory_space<vmem>>, vector<1x24x128xbf16>
    %10 = vector.shape_cast %9 : vector<1x24x128xbf16> to vector<24x128xbf16>
    %cst_10 = arith.constant dense<0.000000e+00> : vector<256x128xf32>
    %11 = tpu.matmul %8, %10, %cst_10 {dimension_numbers = #tpu.dot_dimension_numbers<[1], [0], [0], [1], [0, 0, 1, 1], [], []>} : vector<256x24xbf16>, vector<24x128xbf16>, vector<256x128xf32> -> vector<256x128xf32>
    %12 = arith.addf %6, %11 : vector<256x128xf32>
    %c0_11 = arith.constant 0 : index
    %c0_12 = arith.constant 0 : index
    %c16 = arith.constant 16 : index
    %c0_13 = arith.constant 0 : index
    %13 = vector.load %arg3[%c0_11, %c0_12, %c16, %c0_13] : memref<1x1x288x24xbf16, #tpu.memory_space<vmem>>, vector<1x1x256x24xbf16>
    %14 = vector.shape_cast %13 : vector<1x1x256x24xbf16> to vector<256x24xbf16>
    %c1 = arith.constant 1 : index
    %c0_14 = arith.constant 0 : index
    %c0_15 = arith.constant 0 : index
    %15 = vector.load %arg4[%c1, %c0_14, %c0_15] : memref<3x24x128xbf16, #tpu.memory_space<vmem>>, vector<1x24x128xbf16>
    %16 = vector.shape_cast %15 : vector<1x24x128xbf16> to vector<24x128xbf16>
    %cst_16 = arith.constant dense<0.000000e+00> : vector<256x128xf32>
    %17 = tpu.matmul %14, %16, %cst_16 {dimension_numbers = #tpu.dot_dimension_numbers<[1], [0], [0], [1], [0, 0, 1, 1], [], []>} : vector<256x24xbf16>, vector<24x128xbf16>, vector<256x128xf32> -> vector<256x128xf32>
    %18 = arith.addf %12, %17 : vector<256x128xf32>
    %c0_17 = arith.constant 0 : index
    %c0_18 = arith.constant 0 : index
    %c32 = arith.constant 32 : index
    %c0_19 = arith.constant 0 : index
    %19 = vector.load %arg3[%c0_17, %c0_18, %c32, %c0_19] : memref<1x1x288x24xbf16, #tpu.memory_space<vmem>>, vector<1x1x256x24xbf16>
    %20 = vector.shape_cast %19 : vector<1x1x256x24xbf16> to vector<256x24xbf16>
    %c2 = arith.constant 2 : index
    %c0_20 = arith.constant 0 : index
    %c0_21 = arith.constant 0 : index
    %21 = vector.load %arg4[%c2, %c0_20, %c0_21] : memref<3x24x128xbf16, #tpu.memory_space<vmem>>, vector<1x24x128xbf16>
    %22 = vector.shape_cast %21 : vector<1x24x128xbf16> to vector<24x128xbf16>
    %cst_22 = arith.constant dense<0.000000e+00> : vector<256x128xf32>
    %23 = tpu.matmul %20, %22, %cst_22 {dimension_numbers = #tpu.dot_dimension_numbers<[1], [0], [0], [1], [0, 0, 1, 1], [], []>} : vector<256x24xbf16>, vector<24x128xbf16>, vector<256x128xf32> -> vector<256x128xf32>
    %24 = arith.addf %18, %23 : vector<256x128xf32>
    %25 = arith.mulf %24, %2 : vector<256x128xf32>
    %26 = arith.addf %25, %5 : vector<256x128xf32>
    %cst_23 = arith.constant 0.000000e+00 : f32
    %27 = vector.broadcast %cst_23 : f32 to vector<256x128xf32>
    %28 = arith.subf %27, %26 : vector<256x128xf32>
    %29 = math.exp %28 : vector<256x128xf32>
    %cst_24 = arith.constant 1.000000e+00 : f32
    %30 = vector.broadcast %cst_24 : f32 to vector<256x128xf32>
    %31 = arith.addf %30, %29 : vector<256x128xf32>
    %32 = tpu.reciprocal %31 {approx = true} : vector<256x128xf32> -> vector<256x128xf32>
    %33 = arith.mulf %26, %32 : vector<256x128xf32>
    %34 = arith.truncf %33 : vector<256x128xf32> to vector<256x128xbf16>
    %c0_25 = arith.constant 0 : index
    %c0_26 = arith.constant 0 : index
    %c0_27 = arith.constant 0 : index
    %c0_28 = arith.constant 0 : index
    %35 = vector.load %arg7[%c0_25, %c0_26, %c0_27, %c0_28] : memref<1x1x256x128xbf16, #tpu.memory_space<vmem>>, vector<1x1x256x128xbf16>
    %36 = vector.shape_cast %35 : vector<1x1x256x128xbf16> to vector<256x128xbf16>
    %37 = vector.shape_cast %34 : vector<256x128xbf16> to vector<1x1x256x128xbf16>
    tpu.vector_store %arg7[%c0_25, %c0_26, %c0_27, %c0_28], %37 {strides = array<i32>} : memref<1x1x256x128xbf16, #tpu.memory_space<vmem>>, vector<1x1x256x128xbf16>,
    return
  }
  func.func @transform_0(%arg0: i32, %arg1: i32, %arg2: i32) -> (i32, i32, i32, i32) {
    %c0_i32 = arith.constant 0 : i32
    %c0_i32_0 = arith.constant 0 : i32
    %c0_i32_1 = arith.constant 0 : i32
    return %arg0, %arg2, %c0_i32, %c0_i32_0 : i32, i32, i32, i32
  }
  func.func @transform_1(%arg0: i32, %arg1: i32, %arg2: i32) -> (i32, i32, i32) {
    %c0_i32 = arith.constant 0 : i32
    %c0_i32_0 = arith.constant 0 : i32
    %c0_i32_1 = arith.constant 0 : i32
    return %c0_i32, %c0_i32_0, %arg1 : i32, i32, i32
  }
  func.func @transform_2(%arg0: i32, %arg1: i32, %arg2: i32) -> (i32, i32) {
    %c0_i32 = arith.constant 0 : i32
    %c0_i32_0 = arith.constant 0 : i32
    return %c0_i32, %arg1 : i32, i32
  }
  func.func @transform_3(%arg0: i32, %arg1: i32, %arg2: i32) -> (i32, i32) {
    %c0_i32 = arith.constant 0 : i32
    %c0_i32_0 = arith.constant 0 : i32
    return %c0_i32, %arg1 : i32, i32
  }
  func.func @transform_4(%arg0: i32, %arg1: i32, %arg2: i32) -> (i32, i32, i32, i32) {
    %c0_i32 = arith.constant 0 : i32
    %c0_i32_0 = arith.constant 0 : i32
    return %arg0, %arg2, %c0_i32, %arg1 : i32, i32, i32, i32
  }
}

</mosaic_0001>

<bundles_post_ra>
// kernel: tpu_custom_call.1
= control target key start
LH: loop header
LB: loop body
LE: loop exit
PB: predicated region body
PF: predicated region fallthrough
CT: control target
= control target key end

     0   :  { %9 = vsyncpa [#allocation3], 0  ;;  %s3051_s0 = inlined_call_operand.vmem [shape: bf16[2,1,288,24], index: 0, kind: input, shape index: {}]   ;;  %s3052_s1 = inlined_call_operand.vmem [shape: bf16[3,24,128], index: 1, kind: input, shape index: {}]   ;;  %s3053_s2 = inlined_call_operand.vmem [shape: f32[1,128], index: 2, kind: input, shape index: {}]   ;;  %s3054_s3 = inlined_call_operand.vmem [shape: f32[1,128], index: 3, kind: input, shape index: {}]   ;;  %s3055_s4 = inlined_call_operand.hbm [shape: bf16[2,1,256,128], index: 4, kind: output, shape index: {}]  }
   0x1   :  { %11 = vsyncpa [#allocation3 + $0x1], 0  ;;  %s2582_s15 = smov 0   ;;  %s2584_s16 = smov 0  }
   0x2   :  { %s2586_s17 = smov 0   ;;  %s2588_s18 = smov 0  }
   0x3   :  { %s2590_s19 = smov 0   ;;  %s2592_s20 = smov 0  }
   0x4 LB: > { %s1745_s21 = sadd.s32 4294967295, %s2552_s20   ;;  %s1746_s22 = sadd.s32 4294967294, %s2552_s20   ;;  %s2552_s20 = sphi %s2592_s20, %s17_s20   ;;  %s2548_s19 = sphi %s2590_s19, %s3062_s19   ;;  %s2544_s18 = sphi %s2588_s18, %s3061_s18   ;;  %s2540_s17 = sphi %s2586_s17, %s3060_s17   ;;  %s2536_s16 = sphi %s2584_s16, %s3059_s16   ;;  %s2532_s15 = sphi %s2582_s15, %s3058_s15  }
   0x5   : > { %s36_s23 = sadd.s32 1, %s2548_s19  ;;  %s153_s24 = sadd.s32 1, %s2540_s17 }
   0x6   : > { %p38_p0 = scmp.ge.s32.totalorder %s36_s23, 2  ;;  %p163_p1 = scmp.ne.s32.totalorder %s2540_s17, %s2536_s16 }
   0x7   : > { %p164_p2 = scmp.eq.s32.totalorder %s1745_s21, 1  ;;  %p169_p3 = scmp.ne.s32.totalorder %s2536_s16, %s2532_s15 }
   0x8   : > { %s3064_s23 = smov (%p38_p0, %s36_s23), 0  ;;  %p170_p5 = scmp.eq.s32.totalorder %s1746_s22, 1 }
   0x9   : > { %p2622_p4 = por %p164_p2, %p163_p1  ;;  %s146_s26 = ssub.s32 %s2548_s19, %s3064_s23 }
   0xa   : > { %p1752_p6 = scmp.ge.s32.totalorder %s2552_s20, 1  ;;  %p151_p7 = scmp.eq.s32.totalorder %s146_s26, 0 }
   0xb   : > { %p2629_p8 = por %p170_p5, %p169_p3  ;;  %p219_p9 = scmp.lt.s32.totalorder %s2552_s20, 3 }
   0xc   : > { %s2635_s28 = scalar_select %p151_p7, %s2540_s17, %s153_s24  }
   0xd   : > { %p220_p10 = pnand %p1752_p6, %p219_p9 }
   0xe   : > { %v2307_v0 = vld [vmem:[%s3052_s1 + $0xc] sm:$0xff] (!%p220_p10)   ;;  %vm472_vm0 = vcmask (!%p220_p10), 1043456   ;;  %v2308_v1 = vld [vmem:[%s3052_s1] sm:$0xff] (!%p220_p10)   ;;  %p259_p11 = scmp.lt.s32.totalorder (!%p220_p10), %s2544_s18, 1  ;;  %v2309_v2 = vld [vmem:[%s3052_s1 + $0x14] ss:$0 sps:$4 sm:$0xff] (!%p220_p10)  }
   0xf   : > { %223 = sbr.rel (%p220_p10) target bundleno = 396 (0x18c), region = 36  ;;  %2069 = vmatprep.subr.bf16.mxu1 (!%p220_p10), %v2307_v0  ;;  %2105 = vmatprep.subr.bf16.mxu0 (!%p220_p10), %v2308_v1  ;;  %v2310_v3 = vld [vmem:[%s3052_s1 + $0x8] ss:$0 sps:$4 sm:$0xff] (!%p220_p10)   ;;  %v474_v4 = vsel (!%p220_p10), %vm472_vm0, %v2309_v2, 0  ;;  %v2314_v6 = vld [vmem:[%s3052_s1 + $0x18] sm:$0xff] (!%p220_p10)   ;;  %vm423_vm1 = vcmask (!%p220_p10), 195584  }
  0x10   : > { %2070 = vmatpush3.bf16.msra.mxu1 (!%p220_p10), %v2307_v0  ;;  %2106 = vmatpush3.bf16.msra.mxu0 (!%p220_p10), %v2308_v1  ;;  %v655_v5 = vsel (!%p220_p10), %vm472_vm0, %v2310_v3, 0  ;;  %v2319_v8 = vld [vmem:[%s3052_s1 + $0x20] ss:$0 sps:$4 sm:$0xff] (!%p220_p10)   ;;  %s256_s8 = sand.u32 (!%p220_p10), 1, %s2536_s16  }
  0x11   : > { %2245 = vmatprep.subr.msk.bf16.mxu1 (!%p220_p10), %vm472_vm0, %v2309_v2  ;;  %2246 = vmatprep.subr.msk.bf16.mxu0 (!%p220_p10), %vm472_vm0, %v2310_v3  ;;  %v992_v12 = vsel (!%p220_p10), %vm472_vm0, %v2319_v8, 0  ;;  %v2765_v58 = vld [vmem:[%s3053_s2] ss:$0 sm:$0xff] (!%p220_p10)  ;;  %s2860_s9 = sshll.u32 (!%p220_p10), %s256_s8, 7 }
  0x12   : > { %v2770_v62 = vld [vmem:[%s3054_s3] ss:$0 sm:$0xff] (!%p220_p10)  ;;  %s2875_s10 = scalar_lea.vmem (!%p220_p10), [#allocation2], %s2860_s9 }
  0x14   : > { %2072 = vmatpush3.bf16.msra.mxu1 (!%p220_p10), %v474_v4  ;;  %2108 = vmatpush3.bf16.msra.mxu0 (!%p220_p10), %v655_v5 }
  0x15   : > { %2177 = vmatprep.subr.bf16.mxu1 (!%p220_p10), %v2308_v1  ;;  %2141 = vmatprep.subr.bf16.mxu0 (!%p220_p10), %v2314_v6 }
  0x16   : > { %s260_s11 = scalar_select %p259_p11, %s2544_s18, 1 }
  0x18   : > { %s2249_s12 = smul.u32 144, %s260_s11  ;;  %s1919_s11 = sshll.u32 %s2544_s18, 11 }
  0x19   : > { %s2997_s21 = scalar_lea.hbm %s3055_s4, %s1919_s11  ;;  %s3005_s18 = scalar_lea.sflag [#allocation3], %s256_s8 }
  0x1a   : > { %s2661_s24 = scalar_lea.vmem %s3051_s0, %s2249_s12  ;;  %s1620_s12 = sshll.u32 %s2875_s10, 4  ;;  %s2999_s12 = int_to_ptr.vmem [resolvable:$true] %s1620_s12 }
  0x1b   : > { %v2311_v7 = vld [vmem:[%s2661_s24 + $0x8] sm:$0xff]   ;;  %v2312_v9 = vld [vmem:[%s2661_s24] sm:$0xff]   ;;  %v2313_v10 = vld [vmem:[%s2661_s24 + $0x10] sm:$0xff]   ;;  %s2474_s22 = scalar_lea.vmem %s2999_s12, 2048 }
  0x1c   : > { %2073 = vmatprep.mubr.msk.bf16.mxu1 %vm423_vm1, %v2311_v7  ;;  %2109 = vmatprep.mubr.msk.bf16.mxu0 %vm423_vm1, %v2312_v9  ;;  %v2315_v11 = vld [vmem:[%s2661_s24 + $0x18] sm:$0xff]   ;;  %v2316_v13 = vld [vmem:[%s2661_s24 + $0x20] sm:$0xff]   ;;  %v2317_v14 = vld [vmem:[%s2661_s24 + $0x28] sm:$0xff]   ;;  %p2475_p12 = scmp.ne.s32.totalorder %s2999_s12, %s2474_s22 }
  0x1d   : > { %2074 = vmatmul.mubr.msk.bf16.vlgmr.msra.gmra.mrb[0].mxu1 %vm423_vm1, %v2313_v10  ;;  %2110 = vmatmul.mubr.msk.bf16.vlgmr.msra.gmra.mrb[0].mxu0 %vm423_vm1, %v2311_v7  ;;  %v2318_v15 = vld [vmem:[%s2661_s24 + $0x30] sm:$0xff]   ;;  %v2320_v16 = vld [vmem:[%s2661_s24 + $0x38] sm:$0xff]   ;;  %v2321_v17 = vld [vmem:[%s2661_s24 + $0x40] sm:$0xff]  }
  0x1e   : > { %2179 = vmatpush3.bf16.msra.mxu1 %v2308_v1  ;;  %2142 = vmatpush3.bf16.msra.mxu0 %v2314_v6  ;;  %v2322_v18 = vld [vmem:[%s2661_s24 + $0x48] sm:$0xff]   ;;  %v2323_v19 = vld [vmem:[%s2661_s24 + $0x10] sm:$0xff]   ;;  %v2325_v21 = vld [vmem:[%s2661_s24 + $0x18] sm:$0xff]   ;;  %p2476_p13 = pnand %p2475_p12, %p2622_p4 }
  0x1f   : > { %2077 = vmatprep.mubr.msk.bf16.mxu1 %vm423_vm1, %v2315_v11  ;;  %2113 = vmatprep.mubr.msk.bf16.mxu0 %vm423_vm1, %v2313_v10  ;;  %v2324_v20 = vld [vmem:[%s2661_s24 + $0x50] sm:$0xff]   ;;  %v2326_v22 = vld [vmem:[%s2661_s24 + $0x58] sm:$0xff]   ;;  %v2327_v23 = vld [vmem:[%s2661_s24 + $0x20] sm:$0xff]  }
  0x20   : > { %2248 = vmatprep.subr.msk.bf16.mxu0 %vm472_vm0, %v2319_v8  ;;  %2247 = vmatprep.subr.msk.bf16.mxu1 %vm472_vm0, %v2310_v3  ;;  %v2328_v24 = vld [vmem:[%s2661_s24 + $0x60] sm:$0xff]   ;;  %v2329_v25 = vld [vmem:[%s2661_s24 + $0x28] sm:$0xff]   ;;  %v2331_v27 = vld [vmem:[%s2661_s24 + $0x30] sm:$0xff]   ;;  %p2477_p0 = pneg %p2476_p13 }
  0x21   : > { %v2330_v26 = vld [vmem:[%s2661_s24 + $0x68] sm:$0xff]   ;;  %v2332_v28 = vld [vmem:[%s2661_s24 + $0x70] sm:$0xff]   ;;  %v2333_v29 = vld [vmem:[%s2661_s24 + $0x38] sm:$0xff]  }
  0x22   : > { %2144 = vmatpush3.bf16.msra.mxu0 %v992_v12  ;;  %2180 = vmatpush3.bf16.msra.mxu1 %v655_v5  ;;  %v2334_v30 = vld [vmem:[%s2661_s24 + $0x78] sm:$0xff]   ;;  %v2335_v31 = vld [vmem:[%s2661_s24 + $0x40] sm:$0xff]   ;;  %v2337_v33 = vld [vmem:[%s2661_s24 + $0x48] sm:$0xff]  }
  0x23   : > { %v2336_v32 = vld [vmem:[%s2661_s24 + $0x80] sm:$0xff]   ;;  %v2338_v34 = vld [vmem:[%s2661_s24 + $0x50] sm:$0xff]   ;;  %v2339_v35 = vld [vmem:[%s2661_s24 + $0x58] sm:$0xff]  }
  0x24   : > { %v2340_v36 = vld [vmem:[%s2661_s24 + $0x60] sm:$0xff]   ;;  %v2341_v37 = vld [vmem:[%s2661_s24 + $0x68] sm:$0xff]   ;;  %v2342_v38 = vld [vmem:[%s2661_s24 + $0x70] sm:$0xff]  }
  0x25   : > { %2078 = vmatmul.mubr.msk.bf16.gmra.mrb[4].mxu1 %vm423_vm1, %v2316_v13  ;;  %2114 = vmatmul.mubr.msk.bf16.gmra.mrb[4].mxu0 %vm423_vm1, %v2315_v11  ;;  %v2343_v39 = vld [vmem:[%s2661_s24 + $0x78] sm:$0xff]   ;;  %v2344_v40 = vld [vmem:[%s2661_s24 + $0x80] sm:$0xff]   ;;  %v2345_v41 = vld [vmem:[%s2661_s24 + $0x88] sm:$0xff]   ;;  %s2554_s24 = smov [#allocation2]  }
  0x26   : > { %2081 = vmatprep.mubr.msk.bf16.mxu1 %vm423_vm1, %v2317_v14  ;;  %2117 = vmatprep.mubr.msk.bf16.mxu0 %vm423_vm1, %v2316_v13  ;;  %s2478_s26 = sshll.u32 %s2554_s24, 4  ;;  %s2479_s26 = int_to_ptr.vmem [resolvable:$false] %s2478_s26 }
  0x27   : > { %s2480_s29 = scalar_lea.vmem %s2479_s26, 4096  ;;  %p2481_p1 = scmp.lt.s32.totalorder %s2999_s12, %s2479_s26 }
  0x28   : > { %p2482_p2 = scmp.lt.s32.totalorder %s2480_s29, %s2474_s22 }
  0x2a   : > { %p2483_p3 = por %p2482_p2, %p2481_p1 }
  0x2c   : > { %p2484_p5 = pnand %p2483_p3, %p2477_p0 }
  0x2d   : > { %2082 = vmatmul.mubr.msk.bf16.gmra.mrb[8].mxu1 %vm423_vm1, %v2318_v15  ;;  %2118 = vmatmul.mubr.msk.bf16.gmra.mrb[8].mxu0 %vm423_vm1, %v2317_v14 }
  0x2e   : > { %2085 = vmatprep.mubr.msk.bf16.mxu1 %vm423_vm1, %v2320_v16  ;;  %2121 = vmatprep.mubr.msk.bf16.mxu0 %vm423_vm1, %v2318_v15 }
  0x35   : > { %2086 = vmatmul.mubr.msk.bf16.gmra.mrb[12].mxu1 %vm423_vm1, %v2321_v17  ;;  %2122 = vmatmul.mubr.msk.bf16.gmra.mrb[12].mxu0 %vm423_vm1, %v2320_v16 }
  0x36   : > { %2089 = vmatprep.mubr.msk.bf16.mxu1 %vm423_vm1, %v2322_v18  ;;  %2145 = vmatprep.mubr.msk.bf16.mxu0 %vm423_vm1, %v2323_v19 }
  0x3d   : > { %2090 = vmatmul.mubr.msk.bf16.gmra.mrb[16].mxu1 %vm423_vm1, %v2324_v20  ;;  %2146 = vmatmul.mubr.msk.bf16.vlgmr.msra.gmra.mrb[0].mxu0 %vm423_vm1, %v2325_v21 }
  0x3e   : > { %2093 = vmatprep.mubr.msk.bf16.mxu1 %vm423_vm1, %v2326_v22  ;;  %2149 = vmatprep.mubr.msk.bf16.mxu0 %vm423_vm1, %v2327_v23 }
  0x45   : > { %2094 = vmatmul.mubr.msk.bf16.gmra.mrb[20].mxu1 %vm423_vm1, %v2328_v24  ;;  %2150 = vmatmul.mubr.msk.bf16.gmra.mrb[4].mxu0 %vm423_vm1, %v2329_v25 }
  0x46   : > { %2097 = vmatprep.mubr.msk.bf16.mxu1 %vm423_vm1, %v2330_v26  ;;  %2153 = vmatprep.mubr.msk.bf16.mxu0 %vm423_vm1, %v2331_v27 }
  0x4d   : > { %2098 = vmatmul.mubr.msk.bf16.gmra.mrb[24].mxu1 %vm423_vm1, %v2332_v28  ;;  %2154 = vmatmul.mubr.msk.bf16.gmra.mrb[8].mxu0 %vm423_vm1, %v2333_v29 }
  0x4e   : > { %2101 = vmatprep.mubr.msk.bf16.mxu1 %vm423_vm1, %v2334_v30  ;;  %2157 = vmatprep.mubr.msk.bf16.mxu0 %vm423_vm1, %v2335_v31 }
  0x55   : > { %2102 = vmatmul.mubr.msk.bf16.gmra.mrb[28].mxu1 %vm423_vm1, %v2336_v32  ;;  %2158 = vmatmul.mubr.msk.bf16.gmra.mrb[12].mxu0 %vm423_vm1, %v2337_v33 }
  0x56   : > { %2125 = vmatprep.mubr.msk.bf16.mxu1 %vm423_vm1, %v2321_v17  ;;  %2161 = vmatprep.mubr.msk.bf16.mxu0 %vm423_vm1, %v2338_v34 }
  0x5d   : > { %2126 = vmatmul.mubr.msk.bf16.vlgmr.msra.gmra.mrb[16].mxu1 %vm423_vm1, %v2322_v18  ;;  %2162 = vmatmul.mubr.msk.bf16.gmra.mrb[16].mxu0 %vm423_vm1, %v2339_v35 }
  0x5e   : > { %2129 = vmatprep.mubr.msk.bf16.mxu1 %vm423_vm1, %v2324_v20  ;;  %2165 = vmatprep.mubr.msk.bf16.mxu0 %vm423_vm1, %v2340_v36 }
  0x65   : > { %2130 = vmatmul.mubr.msk.bf16.gmra.mrb[20].mxu1 %vm423_vm1, %v2326_v22  ;;  %2166 = vmatmul.mubr.msk.bf16.gmra.mrb[20].mxu0 %vm423_vm1, %v2341_v37 }
  0x66   : > { %2133 = vmatprep.mubr.msk.bf16.mxu1 %vm423_vm1, %v2328_v24  ;;  %2169 = vmatprep.mubr.msk.bf16.mxu0 %vm423_vm1, %v2342_v38 }
  0x6d   : > { %2134 = vmatmul.mubr.msk.bf16.gmra.mrb[24].mxu1 %vm423_vm1, %v2330_v26  ;;  %2170 = vmatmul.mubr.msk.bf16.gmra.mrb[24].mxu0 %vm423_vm1, %v2343_v39 }
  0x6e   : > { %2137 = vmatprep.mubr.msk.bf16.mxu1 %vm423_vm1, %v2332_v28  ;;  %2173 = vmatprep.mubr.msk.bf16.mxu0 %vm423_vm1, %v2344_v40 }
  0x75   : > { %2138 = vmatmul.mubr.msk.bf16.gmra.mrb[28].mxu1 %vm423_vm1, %v2334_v30  ;;  %2174 = vmatmul.mubr.msk.bf16.gmra.mrb[28].mxu0 %vm423_vm1, %v2345_v41 }
  0xf0   : > { %v2075_v42 = vpop.f32.mrb[0].mxu1 }
  0xf1   : > { %v510_v43 = vpop.f32.mrb[1].mxu1 }
  0xf2   : > { %v2076_v44 = vpop.f32.mrb[2].mxu1 }
  0xf3   : > { %v513_v45 = vpop.f32.mrb[3].mxu1 }
  0xf8   : > { %v2079_v46 = vpop.f32.mrb[4].mxu1 }
  0xf9   : > { %v526_v47 = vpop.f32.mrb[5].mxu1 }
  0xfa   : > { %v2080_v48 = vpop.f32.mrb[6].mxu1 }
  0xfb   : > { %v529_v49 = vpop.f32.mrb[7].mxu1 }
 0x100   : > { %v2083_v50 = vpop.f32.mrb[8].mxu1 }
 0x101   : > { %v542_v51 = vpop.f32.mrb[9].mxu1 }
 0x102   : > { %v2750_v52 = vpop.f32.mrb[10].mxu1 }
 0x103   : > { %v2752_v53 = vpop.f32.mrb[11].mxu1 }
 0x108   : > { %v2754_v54 = vpop.f32.mrb[12].mxu1 }
 0x109   : > { %v2756_v55 = vpop.f32.mrb[13].mxu1 }
 0x10a   : > { %v2758_v56 = vpop.f32.mrb[14].mxu1 }
 0x10b   : > { %v2760_v57 = vpop.f32.mrb[15].mxu1 }
 0x110   : > { %v2147_v59 = vpop.f32.mrb[0].mxu0 }
 0x111   : > { %v2181_v60 = vadd.f32 %v2147_v59, %v2075_v42  ;;  %v1028_v61 = vpop.f32.mrb[1].mxu0 }
 0x112   : > { %v2182_v63 = vadd.f32 %v1028_v61, %v510_v43  ;;  %v2148_v0 = vpop.f32.mrb[2].mxu0 }
 0x113   : > { %v1189_v1 = vmul.f32 %v2181_v60, %v2765_v58  ;;  %v2183_v2 = vadd.f32 %v2148_v0, %v2076_v44  ;;  %v1031_v3 = vpop.f32.mrb[3].mxu0 }
 0x114   : > { %v1187_v4 = vmul.f32 %v2182_v63, %v2765_v58  ;;  %v2184_v5 = vadd.f32 %v1031_v3, %v513_v45 }
 0x115   : > { %v2775_v6 = vadd.f32 %v2770_v62, %v1189_v1  ;;  %v1190_v7 = vmul.f32 %v2183_v2, %v2765_v58 }
 0x116   : > { %v2779_v8 = vadd.f32 %v2770_v62, %v1187_v4  ;;  %v1188_v9 = vmul.f32 %v2184_v5, %v2765_v58 }
 0x117   : > { %v1253_v10 = vsub.f32 0.0, %v2775_v6  ;;  %v2784_v11 = vadd.f32 %v2770_v62, %v1190_v7 }
 0x118   : > { %v1251_v12 = vsub.f32 0.0, %v2779_v8  ;;  %v2788_v13 = vadd.f32 %v2770_v62, %v1188_v9  ;;  %v2151_v14 = vpop.f32.mrb[4].mxu0 }
 0x119   : > { %v1287_v15 = vmul.f32 1.442695, %v1253_v10  ;;  %v1254_v16 = vsub.f32 0.0, %v2784_v11  ;;  %v2185_v17 = vadd.f32 %v2151_v14, %v2079_v46  ;;  %v1044_v18 = vpop.f32.mrb[5].mxu0 }
 0x11a   : > { %v1283_v19 = vmul.f32 1.442695, %v1251_v12  ;;  %v1252_v20 = vsub.f32 0.0, %v2788_v13  ;;  %v2186_v21 = vadd.f32 %v1044_v18, %v526_v47  ;;  %v2152_v22 = vpop.f32.mrb[6].mxu0 }
 0x11b   : > { %2346 = vpow2.f32 %v1287_v15  ;;  %v1289_v23 = vmul.f32 1.442695, %v1254_v16  ;;  %v1193_v24 = vmul.f32 %v2185_v17, %v2765_v58  ;;  %v2187_v25 = vadd.f32 %v2152_v22, %v2080_v48  ;;  %v1047_v26 = vpop.f32.mrb[7].mxu0 }
 0x11c   : > { %2348 = vpow2.f32 %v1283_v19  ;;  %v1285_v27 = vmul.f32 1.442695, %v1252_v20  ;;  %v1191_v28 = vmul.f32 %v2186_v21, %v2765_v58  ;;  %v2188_v29 = vadd.f32 %v1047_v26, %v529_v49 }
 0x11d   : > { %2350 = vpow2.f32 %v1289_v23  ;;  %v2795_v30 = vadd.f32 %v2770_v62, %v1193_v24  ;;  %v1194_v31 = vmul.f32 %v2187_v25, %v2765_v58 }
 0x11e   : > { %2352 = vpow2.f32 %v1285_v27  ;;  %v2799_v32 = vadd.f32 %v2770_v62, %v1191_v28  ;;  %v1192_v33 = vmul.f32 %v2188_v29, %v2765_v58 }
 0x11f   : > { %v1257_v34 = vsub.f32 0.0, %v2795_v30  ;;  %v2804_v35 = vadd.f32 %v2770_v62, %v1194_v31 }
 0x120   : > { %v1255_v36 = vsub.f32 0.0, %v2799_v32  ;;  %v2808_v37 = vadd.f32 %v2770_v62, %v1192_v33  ;;  %v2155_v38 = vpop.f32.mrb[8].mxu0 }
 0x121   : > { %v1295_v39 = vmul.f32 1.442695, %v1257_v34  ;;  %v1258_v40 = vsub.f32 0.0, %v2804_v35  ;;  %v2189_v41 = vadd.f32 %v2155_v38, %v2083_v50  ;;  %v1060_v42 = vpop.f32.mrb[9].mxu0 }
 0x122   : > { %v1291_v43 = vmul.f32 1.442695, %v1255_v36  ;;  %v1256_v44 = vsub.f32 0.0, %v2808_v37  ;;  %v2190_v45 = vadd.f32 %v1060_v42, %v542_v51  ;;  %v2156_v46 = vpop.f32.mrb[10].mxu0 }
 0x123   : > { %2354 = vpow2.f32 %v1295_v39  ;;  %v1297_v47 = vmul.f32 1.442695, %v1258_v40  ;;  %v1197_v48 = vmul.f32 %v2189_v41, %v2765_v58  ;;  %v2191_v49 = vadd.f32 %v2156_v46, %v2750_v52  ;;  %v1063_v59 = vpop.f32.mrb[11].mxu0 }
 0x124   : > { %2356 = vpow2.f32 %v1291_v43  ;;  %v1293_v60 = vmul.f32 1.442695, %v1256_v44  ;;  %v1195_v61 = vmul.f32 %v2190_v45, %v2765_v58  ;;  %v2192_v63 = vadd.f32 %v1063_v59, %v2752_v53 }
 0x125   : > { %v2347_v50 = vpop.eup %2346  ;;  %2358 = vpow2.f32 %v1297_v47  ;;  %v2817_v0 = vadd.f32 %v2770_v62, %v1197_v48  ;;  %v1198_v51 = vmul.f32 %v2191_v49, %v2765_v58 }
 0x126   : > { %v2349_v1 = vpop.eup %2348  ;;  %v1349_v2 = vadd.f32 1.0, %v2347_v50  ;;  %2360 = vpow2.f32 %v1293_v60  ;;  %v2821_v3 = vadd.f32 %v2770_v62, %v1195_v61  ;;  %v1196_v52 = vmul.f32 %v2192_v63, %v2765_v58 }
 0x127   : > { %v2351_v4 = vpop.eup %2350  ;;  %v1347_v5 = vadd.f32 1.0, %v2349_v1  ;;  %v1261_v7 = vsub.f32 0.0, %v2817_v0  ;;  %v2826_v53 = vadd.f32 %v2770_v62, %v1198_v51 }
 0x128   : > { %v2353_v9 = vpop.eup %2352  ;;  %2362 = vrcp.f32 %v1349_v2  ;;  %v1350_v10 = vadd.f32 1.0, %v2351_v4  ;;  %v1259_v12 = vsub.f32 0.0, %v2821_v3  ;;  %v2830_v14 = vadd.f32 %v2770_v62, %v1196_v52  ;;  %v2159_v15 = vpop.f32.mrb[12].mxu0 }
 0x129   : > { %2364 = vrcp.f32 %v1347_v5  ;;  %v1348_v16 = vadd.f32 1.0, %v2353_v9  ;;  %v1303_v17 = vmul.f32 1.442695, %v1261_v7  ;;  %v1262_v18 = vsub.f32 0.0, %v2826_v53  ;;  %v1076_v19 = vpop.f32.mrb[13].mxu0 }
 0x12a   : > { %2366 = vrcp.f32 %v1350_v10  ;;  %v1299_v20 = vmul.f32 1.442695, %v1259_v12  ;;  %v1260_v21 = vsub.f32 0.0, %v2830_v14  ;;  %v2193_v22 = vadd.f32 %v2159_v15, %v2754_v54  ;;  %v2160_v23 = vpop.f32.mrb[14].mxu0 }
 0x12b   : > { %2368 = vrcp.f32 %v1348_v16  ;;  %v1305_v24 = vmul.f32 1.442695, %v1262_v18  ;;  %v2194_v25 = vadd.f32 %v1076_v19, %v2756_v55  ;;  %v2195_v26 = vadd.f32 %v2160_v23, %v2758_v56  ;;  %v1079_v27 = vpop.f32.mrb[15].mxu0 }
 0x12c   : > { %2370 = vpow2.f32 %v1303_v17  ;;  %v1301_v28 = vmul.f32 1.442695, %v1260_v21  ;;  %v1201_v29 = vmul.f32 %v2193_v22, %v2765_v58  ;;  %v2196_v31 = vadd.f32 %v1079_v27, %v2760_v57 }
 0x12d   : > { %v2355_v33 = vpop.eup %2354  ;;  %2372 = vpow2.f32 %v1299_v20  ;;  %v1199_v34 = vmul.f32 %v2194_v25, %v2765_v58  ;;  %v1202_v54 = vmul.f32 %v2195_v26, %v2765_v58 }
 0x12e   : > { %v2357_v36 = vpop.eup %2356  ;;  %v1353_v38 = vadd.f32 1.0, %v2355_v33  ;;  %2374 = vpow2.f32 %v1305_v24  ;;  %v2842_v55 = vadd.f32 %v2770_v62, %v1201_v29  ;;  %v1200_v56 = vmul.f32 %v2196_v31, %v2765_v58 }
 0x12f   : > { %v2359_v39 = vpop.eup %2358  ;;  %v1351_v40 = vadd.f32 1.0, %v2357_v36  ;;  %2376 = vpow2.f32 %v1301_v28  ;;  %v2847_v57 = vadd.f32 %v2770_v62, %v1199_v34  ;;  %v2850_v41 = vadd.f32 %v2770_v62, %v1202_v54 }
 0x130   : > { %v2361_v42 = vpop.eup %2360  ;;  %2378 = vrcp.f32 %v1353_v38  ;;  %v1354_v43 = vadd.f32 1.0, %v2359_v39  ;;  %v1265_v44 = vsub.f32 0.0, %v2842_v55  ;;  %v2854_v45 = vadd.f32 %v2770_v62, %v1200_v56  ;;  %v2127_v46 = vpop.f32.mrb[16].mxu1 }
 0x131   : > { %v2163_v47 = vpop.f32.mrb[16].mxu0  ;;  %2380 = vrcp.f32 %v1351_v40  ;;  %v1352_v48 = vadd.f32 1.0, %v2361_v42  ;;  %v1263_v49 = vsub.f32 0.0, %v2847_v57  ;;  %v1266_v59 = vsub.f32 0.0, %v2850_v41  ;;  %v755_v60 = vpop.f32.mrb[17].mxu1 }
 0x132   : > { %v1092_v61 = vpop.f32.mrb[17].mxu0  ;;  %v2363_v63 = vpop.eup %2362  ;;  %2382 = vrcp.f32 %v1354_v43  ;;  %v1311_v50 = vmul.f32 1.442695, %v1265_v44  ;;  %v1264_v51 = vsub.f32 0.0, %v2854_v45  ;;  %v2197_v1 = vadd.f32 %v2163_v47, %v2127_v46 }
 0x133   : > { %v2128_v2 = vpop.f32.mrb[18].mxu1  ;;  %v2164_v52 = vpop.f32.mrb[18].mxu0  ;;  %v1413_v5 = vmul.f32 %v2363_v63, %v2775_v6  ;;  %2384 = vrcp.f32 %v1352_v48  ;;  %v1307_v7 = vmul.f32 1.442695, %v1263_v49  ;;  %v1313_v9 = vmul.f32 1.442695, %v1266_v59 }
 0x134   : > { %v2365_v4 = vpop.eup %2364  ;;  %v758_v10 = vpop.f32.mrb[19].mxu1  ;;  %2386 = vpow2.f32 %v1311_v50  ;;  %v1309_v17 = vmul.f32 1.442695, %v1264_v51  ;;  %v1205_v18 = vmul.f32 %v2197_v1, %v2765_v58  ;;  %v2198_v21 = vadd.f32 %v1092_v61, %v755_v60 }
 0x135   : > { %v1095_v12 = vpop.f32.mrb[19].mxu0  ;;  %v2367_v15 = vpop.eup %2366  ;;  %v1411_v16 = vmul.f32 %v2365_v4, %v2779_v8  ;;  %2388 = vpow2.f32 %v1307_v7  ;;  %v2199_v22 = vadd.f32 %v2164_v52, %v2128_v2 }
 0x136   : > { %v2369_v19 = vpop.eup %2368  ;;  %v1414_v20 = vmul.f32 %v2367_v15, %v2784_v11  ;;  %2390 = vpow2.f32 %v1313_v9  ;;  %v2869_v24 = vadd.f32 %v2770_v62, %v1205_v18  ;;  %v2200_v25 = vadd.f32 %v1095_v12, %v758_v10 }
 0x137   : > { %v2371_v23 = vpop.eup %2370  ;;  %v1412_v6 = vmul.f32 %v2369_v19, %v2788_v13  ;;  %2392 = vpow2.f32 %v1309_v17  ;;  %v1203_v28 = vmul.f32 %v2198_v21, %v2765_v58  ;;  %v1206_v34 = vmul.f32 %v2199_v22, %v2765_v58 }
 0x138   : > { %v2373_v8 = vpop.eup %2372  ;;  %v1928_v26 = vpack.c.bf16 %v1414_v20, %v1413_v5  ;;  %v1357_v27 = vadd.f32 1.0, %v2371_v23  ;;  %v1269_v33 = vsub.f32 0.0, %v2869_v24  ;;  %v2131_v13 = vpop.f32.mrb[20].mxu1  ;;  %v1204_v39 = vmul.f32 %v2200_v25, %v2765_v58 }
 0x139   : > { %v2375_v29 = vpop.eup %2374  ;;  %v1923_v11 = vpack.c.bf16 %v1412_v6, %v1411_v16  ;;  %v1355_v31 = vadd.f32 1.0, %v2373_v8  ;;  %v2167_v54 = vpop.f32.mrb[20].mxu0  ;;  %v2879_v56 = vadd.f32 %v2770_v62, %v1203_v28  ;;  %v2884_v47 = vadd.f32 %v2770_v62, %v1206_v34 }
 0x13a   : > { %v2377_v36 = vpop.eup %2376  ;;  %2000 = vst [vmem:[%s2875_s10 + $0x8] sm:$0xff] %v1928_v26   ;;  %2394 = vrcp.f32 %v1357_v27  ;;  %v1358_v38 = vadd.f32 1.0, %v2375_v29  ;;  %v771_v40 = vpop.f32.mrb[21].mxu1  ;;  %v1319_v46 = vmul.f32 1.442695, %v1269_v33  ;;  %v2889_v63 = vadd.f32 %v2770_v62, %v1204_v39 }
 0x13b   : > { %v1108_v42 = vpop.f32.mrb[21].mxu0  ;;  %v2379_v43 = vpop.eup %2378  ;;  %1924 = vst [vmem:[%s2875_s10] sm:$0xff] %v1923_v11   ;;  %2396 = vrcp.f32 %v1355_v31  ;;  %v1356_v44 = vadd.f32 1.0, %v2377_v36  ;;  %v1267_v61 = vsub.f32 0.0, %v2879_v56  ;;  %v1270_v52 = vsub.f32 0.0, %v2884_v47 }
 0x13c   : > { %v2132_v48 = vpop.f32.mrb[22].mxu1  ;;  %v2168_v49 = vpop.f32.mrb[22].mxu0  ;;  %v1417_v60 = vmul.f32 %v2379_v43, %v2795_v30  ;;  %2398 = vrcp.f32 %v1358_v38  ;;  %v2201_v4 = vadd.f32 %v2167_v54, %v2131_v13  ;;  %v1268_v9 = vsub.f32 0.0, %v2889_v63 }
 0x13d   : > { %v2381_v59 = vpop.eup %2380  ;;  %v774_v50 = vpop.f32.mrb[23].mxu1  ;;  %2400 = vrcp.f32 %v1356_v44  ;;  %v1315_v30 = vmul.f32 1.442695, %v1267_v61  ;;  %v1321_v15 = vmul.f32 1.442695, %v1270_v52  ;;  %v2202_v17 = vadd.f32 %v1108_v42, %v771_v40 }
 0x13e   : > { %v1111_v51 = vpop.f32.mrb[23].mxu0  ;;  %v2383_v1 = vpop.eup %2382  ;;  %v1415_v2 = vmul.f32 %v2381_v59, %v2799_v32  ;;  %2402 = vpow2.f32 %v1319_v46  ;;  %v1209_v16 = vmul.f32 %v2201_v4, %v2765_v58  ;;  %v1317_v20 = vmul.f32 1.442695, %v1268_v9 }
 0x13f   : > { %v2385_v5 = vpop.eup %2384  ;;  %v1418_v7 = vmul.f32 %v2383_v1, %v2804_v35  ;;  %2404 = vpow2.f32 %v1315_v30  ;;  %v1207_v26 = vmul.f32 %v2202_v17, %v2765_v58  ;;  %v2203_v27 = vadd.f32 %v2168_v49, %v2132_v48 }
 0x140   : > { %v2387_v10 = vpop.eup %2386  ;;  %v1416_v12 = vmul.f32 %v2385_v5, %v2808_v37  ;;  %2406 = vpow2.f32 %v1321_v15  ;;  %v2898_v23 = vadd.f32 %v2770_v62, %v1209_v16  ;;  %v2135_v6 = vpop.f32.mrb[24].mxu1  ;;  %v2204_v33 = vadd.f32 %v1111_v51, %v774_v50 }
 0x141   : > { %v2389_v32 = vpop.eup %2388  ;;  %v1938_v18 = vpack.c.bf16 %v1418_v7, %v1417_v60  ;;  %v1361_v19 = vadd.f32 1.0, %v2387_v10  ;;  %v2171_v37 = vpop.f32.mrb[24].mxu0  ;;  %v2905_v36 = vadd.f32 %v2770_v62, %v1207_v26  ;;  %v1210_v38 = vmul.f32 %v2203_v27, %v2765_v58 }
 0x142   : > { %v2391_v21 = vpop.eup %2390  ;;  %v1933_v35 = vpack.c.bf16 %v1416_v12, %v1415_v2  ;;  %v1359_v22 = vadd.f32 1.0, %v2389_v32  ;;  %v787_v28 = vpop.f32.mrb[25].mxu1  ;;  %v1273_v31 = vsub.f32 0.0, %v2898_v23  ;;  %v2205_v39 = vadd.f32 %v2171_v37, %v2135_v6 }
 0x143   : > { %v2393_v25 = vpop.eup %2392  ;;  %2002 = vst [vmem:[%s2875_s10 + $0x18] sm:$0xff] %v1938_v18   ;;  %2408 = vrcp.f32 %v1361_v19  ;;  %v1362_v8 = vadd.f32 1.0, %v2391_v21  ;;  %v1124_v29 = vpop.f32.mrb[25].mxu0  ;;  %v1208_v48 = vmul.f32 %v2204_v33, %v2765_v58  ;;  %v1271_v60 = vsub.f32 0.0, %v2905_v36 }
 0x144   : > { %2001 = vst [vmem:[%s2875_s10 + $0x10] sm:$0xff] %v1933_v35   ;;  %2410 = vrcp.f32 %v1359_v22  ;;  %v1360_v11 = vadd.f32 1.0, %v2393_v25  ;;  %v2136_v34 = vpop.f32.mrb[26].mxu1  ;;  %v2172_v13 = vpop.f32.mrb[26].mxu0  ;;  %v1327_v46 = vmul.f32 1.442695, %v1273_v31  ;;  %v2913_v61 = vadd.f32 %v2770_v62, %v1210_v38 }
 0x145   : > { %v2395_v54 = vpop.eup %2394  ;;  %2412 = vrcp.f32 %v1362_v8  ;;  %v790_v40 = vpop.f32.mrb[27].mxu1  ;;  %v2917_v1 = vadd.f32 %v2770_v62, %v1208_v48  ;;  %v1323_v4 = vmul.f32 1.442695, %v1271_v60  ;;  %v2206_v5 = vadd.f32 %v1124_v29, %v787_v28 }
 0x146   : > { %v1127_v42 = vpop.f32.mrb[27].mxu0  ;;  %v2397_v43 = vpop.eup %2396  ;;  %v1421_v44 = vmul.f32 %v2395_v54, %v2817_v0  ;;  %2414 = vrcp.f32 %v1360_v11  ;;  %v1213_v0 = vmul.f32 %v2205_v39, %v2765_v58  ;;  %v2207_v26 = vadd.f32 %v2172_v13, %v2136_v34 }
 0x147   : > { %v2399_v49 = vpop.eup %2398  ;;  %v1419_v59 = vmul.f32 %v2397_v43, %v2821_v3  ;;  %2416 = vpow2.f32 %v1317_v20  ;;  %v1274_v3 = vsub.f32 0.0, %v2913_v61  ;;  %v1272_v9 = vsub.f32 0.0, %v2917_v1 }
 0x148   : > { %v2401_v50 = vpop.eup %2400  ;;  %v1422_v51 = vmul.f32 %v2399_v49, %v2826_v53  ;;  %2418 = vpow2.f32 %v1327_v46  ;;  %v2924_v53 = vadd.f32 %v2770_v62, %v1213_v0  ;;  %v2139_v10 = vpop.f32.mrb[28].mxu1  ;;  %v2208_v33 = vadd.f32 %v1127_v42, %v790_v40 }
 0x149   : > { %v2403_v2 = vpop.eup %2402  ;;  %v1420_v52 = vmul.f32 %v2401_v50, %v2830_v14  ;;  %v2175_v12 = vpop.f32.mrb[28].mxu0  ;;  %2420 = vpow2.f32 %v1323_v4  ;;  %v1329_v17 = vmul.f32 1.442695, %v1274_v3  ;;  %v1211_v14 = vmul.f32 %v2206_v5, %v2765_v58 }
 0x14a   : > { %v1948_v7 = vpack.c.bf16 %v1422_v51, %v1421_v44  ;;  %v1365_v30 = vadd.f32 1.0, %v2403_v2  ;;  %v2405_v15 = vpop.eup %2404  ;;  %v803_v32 = vpop.f32.mrb[29].mxu1  ;;  %v1325_v21 = vmul.f32 1.442695, %v1272_v9  ;;  %v1277_v35 = vsub.f32 0.0, %v2924_v53 }
 0x14b   : > { %v1943_v16 = vpack.c.bf16 %v1420_v52, %v1419_v59  ;;  %v1140_v18 = vpop.f32.mrb[29].mxu0  ;;  %v2407_v19 = vpop.eup %2406  ;;  %v1363_v20 = vadd.f32 1.0, %v2405_v15  ;;  %v2931_v8 = vadd.f32 %v2770_v62, %v1211_v14  ;;  %v1214_v43 = vmul.f32 %v2207_v26, %v2765_v58 }
 0x14c   : > { %2004 = vst [vmem:[%s2875_s10 + $0x28] sm:$0xff] %v1948_v7   ;;  %2422 = vrcp.f32 %v1365_v30  ;;  %v2140_v22 = vpop.f32.mrb[30].mxu1  ;;  %v2176_v6 = vpop.f32.mrb[30].mxu0  ;;  %v1366_v25 = vadd.f32 1.0, %v2407_v19  ;;  %v1335_v31 = vmul.f32 1.442695, %v1277_v35  ;;  %v1212_v34 = vmul.f32 %v2208_v33, %v2765_v58 }
 0x14d   : > { %v2409_v37 = vpop.eup %2408  ;;  %2003 = vst [vmem:[%s2875_s10 + $0x20] sm:$0xff] %v1943_v16   ;;  %2424 = vpow2.f32 %v1329_v17  ;;  %v806_v27 = vpop.f32.mrb[31].mxu1  ;;  %v1275_v39 = vsub.f32 0.0, %v2931_v8  ;;  %v2209_v13 = vadd.f32 %v2175_v12, %v2139_v10  ;;  %v2210_v52 = vadd.f32 %v1140_v18, %v803_v32 }
 0x14e   : > { %v1143_v28 = vpop.f32.mrb[31].mxu0  ;;  %v2411_v29 = vpop.eup %2410  ;;  %v1425_v11 = vmul.f32 %v2409_v37, %v2842_v55  ;;  %2426 = vrcp.f32 %v1363_v20  ;;  %v2944_v60 = vadd.f32 %v2770_v62, %v1212_v34  ;;  %v2211_v5 = vadd.f32 %v2176_v6, %v2140_v22 }
 0x14f   : > { %v2413_v54 = vpop.eup %2412  ;;  %v1423_v38 = vmul.f32 %v2411_v29, %v2847_v57  ;;  %2428 = vrcp.f32 %v1366_v25  ;;  %v1331_v40 = vmul.f32 1.442695, %v1275_v39  ;;  %v2941_v57 = vadd.f32 %v2770_v62, %v1214_v43 }
 0x150   : > { %v2415_v44 = vpop.eup %2414  ;;  %v1426_v46 = vmul.f32 %v2413_v54, %v2850_v41  ;;  %2430 = vpow2.f32 %v1325_v21  ;;  %v1217_v41 = vmul.f32 %v2209_v13, %v2765_v58  ;;  %v2212_v7 = vadd.f32 %v1143_v28, %v806_v27 }
 0x151   : > { %v2417_v55 = vpop.eup %2416  ;;  %v1424_v48 = vmul.f32 %v2415_v44, %v2854_v45  ;;  %2432 = vpow2.f32 %v1335_v31  ;;  %v1278_v0 = vsub.f32 0.0, %v2941_v57  ;;  %v1276_v45 = vsub.f32 0.0, %v2944_v60 }
 0x152   : > { %v2419_v42 = vpop.eup %2418  ;;  %v1958_v49 = vpack.c.bf16 %v1426_v46, %v1425_v11  ;;  %v1364_v59 = vadd.f32 1.0, %v2417_v55  ;;  %2434 = vpow2.f32 %v1331_v40  ;;  %v2951_v2 = vadd.f32 %v2770_v62, %v1217_v41 }
 0x153   : > { %v1953_v50 = vpack.c.bf16 %v1424_v48, %v1423_v38  ;;  %v1369_v51 = vadd.f32 1.0, %v2419_v42  ;;  %v2421_v4 = vpop.eup %2420  ;;  %v1337_v3 = vmul.f32 1.442695, %v1278_v0  ;;  %v1333_v10 = vmul.f32 1.442695, %v1276_v45 }
 0x154   : > { %2006 = vst [vmem:[%s2875_s10 + $0x38] sm:$0xff] %v1958_v49   ;;  %2436 = vrcp.f32 %v1364_v59  ;;  %v1367_v9 = vadd.f32 1.0, %v2421_v4  ;;  %v1281_v12 = vsub.f32 0.0, %v2951_v2  ;;  %v1215_v15 = vmul.f32 %v2210_v52, %v2765_v58 }
 0x155   : > { %2005 = vst [vmem:[%s2875_s10 + $0x30] sm:$0xff] %v1953_v50   ;;  %2438 = vrcp.f32 %v1369_v51  ;;  %v1218_v17 = vmul.f32 %v2211_v5, %v2765_v58  ;;  %v1216_v14 = vmul.f32 %v2212_v7, %v2765_v58 }
 0x156   : > { %v2423_v30 = vpop.eup %2422  ;;  %2440 = vpow2.f32 %v1337_v3  ;;  %v1343_v19 = vmul.f32 1.442695, %v1281_v12  ;;  %v2959_v20 = vadd.f32 %v2770_v62, %v1215_v15 }
 0x157   : > { %v2425_v16 = vpop.eup %2424  ;;  %2442 = vrcp.f32 %v1367_v9  ;;  %v2962_v35 = vadd.f32 %v2770_v62, %v1218_v17  ;;  %v2965_v22 = vadd.f32 %v2770_v62, %v1216_v14  ;;  %v1429_v37 = vmul.f32 %v2423_v30, %v2869_v24 }
 0x158   : > { %v2427_v32 = vpop.eup %2426  ;;  %v1370_v18 = vadd.f32 1.0, %v2425_v16  ;;  %2444 = vpow2.f32 %v1333_v10  ;;  %v1279_v25 = vsub.f32 0.0, %v2959_v20 }
 0x159   : > { %v2429_v21 = vpop.eup %2428  ;;  %v1282_v28 = vsub.f32 0.0, %v2962_v35  ;;  %v1280_v29 = vsub.f32 0.0, %v2965_v22  ;;  %v1427_v39 = vmul.f32 %v2427_v32, %v2879_v56 }
 0x15a   : > { %v2431_v6 = vpop.eup %2430  ;;  %v1430_v58 = vmul.f32 %v2429_v21, %v2884_v47  ;;  %2446 = vrcp.f32 %v1370_v18  ;;  %v1339_v62 = vmul.f32 1.442695, %v1279_v25 }
 0x15b   : > { %v2433_v26 = vpop.eup %2432  ;;  %v1368_v27 = vadd.f32 1.0, %v2431_v6  ;;  %2448 = vpow2.f32 %v1343_v19  ;;  %v1345_v54 = vmul.f32 1.442695, %v1282_v28  ;;  %v1341_v47 = vmul.f32 1.442695, %v1280_v29 }
 0x15c   : > { %v1968_v11 = vpack.c.bf16 %v1430_v58, %v1429_v37  ;;  %v1373_v31 = vadd.f32 1.0, %v2433_v26  ;;  %v2435_v33 = vpop.eup %2434 }
 0x15d   : > { %2450 = vrcp.f32 %v1368_v27  ;;  %v1371_v44 = vadd.f32 1.0, %v2435_v33 }
 0x15e   : > { %v2437_v24 = vpop.eup %2436  ;;  %2008 = vst [vmem:[%s2875_s10 + $0x48] sm:$0xff] %v1968_v11   ;;  %2452 = vpow2.f32 %v1339_v62 }
 0x15f   : > { %v2439_v38 = vpop.eup %2438  ;;  %v1428_v43 = vmul.f32 %v2437_v24, %v2889_v63  ;;  %2454 = vrcp.f32 %v1373_v31 }
 0x160   : > { %v2441_v46 = vpop.eup %2440  ;;  %2456 = vpow2.f32 %v1345_v54  ;;  %v1433_v56 = vmul.f32 %v2439_v38, %v2898_v23 }
 0x161   : > { %v1963_v34 = vpack.c.bf16 %v1428_v43, %v1427_v39  ;;  %v2443_v13 = vpop.eup %2442  ;;  %v1374_v55 = vadd.f32 1.0, %v2441_v46  ;;  %2458 = vpow2.f32 %v1341_v47 }
 0x162   : > { %v2445_v48 = vpop.eup %2444  ;;  %2460 = vrcp.f32 %v1371_v44  ;;  %v1431_v50 = vmul.f32 %v2443_v13, %v2905_v36 }
 0x163   : > { %2007 = vst [vmem:[%s2875_s10 + $0x40] sm:$0xff] %v1963_v34   ;;  %2462 = vrcp.f32 %v1374_v55  ;;  %v1372_v42 = vadd.f32 1.0, %v2445_v48 }
 0x164   : > { %v2447_v40 = vpop.eup %2446 }
 0x165   : > { %v2449_v49 = vpop.eup %2448  ;;  %v1434_v63 = vmul.f32 %v2447_v40, %v2913_v61  ;;  %2464 = vrcp.f32 %v1372_v42 }
 0x166   : > { %v1377_v0 = vadd.f32 1.0, %v2449_v49 }
 0x167   : > { %v2451_v59 = vpop.eup %2450  ;;  %v1978_v41 = vpack.c.bf16 %v1434_v63, %v1433_v56 }
 0x168   : > { %v1432_v51 = vmul.f32 %v2451_v59, %v2917_v1  ;;  %v2453_v45 = vpop.eup %2452  ;;  %2466 = vrcp.f32 %v1377_v0 }
 0x169   : > { %2010 = vst [vmem:[%s2875_s10 + $0x58] sm:$0xff] %v1978_v41   ;;  %v2455_v52 = vpop.eup %2454  ;;  %v1375_v3 = vadd.f32 1.0, %v2453_v45 }
 0x16a   : > { %v1973_v4 = vpack.c.bf16 %v1432_v51, %v1431_v50  ;;  %v2457_v5 = vpop.eup %2456  ;;  %v1437_v1 = vmul.f32 %v2455_v52, %v2924_v53 }
 0x16b   : > { %v2459_v7 = vpop.eup %2458  ;;  %v1378_v23 = vadd.f32 1.0, %v2457_v5  ;;  %2468 = vrcp.f32 %v1375_v3 }
 0x16c   : > { %2009 = vst [vmem:[%s2875_s10 + $0x50] sm:$0xff] %v1973_v4   ;;  %v2461_v61 = vpop.eup %2460  ;;  %v1376_v30 = vadd.f32 1.0, %v2459_v7 }
 0x16d   : > { %v2463_v36 = vpop.eup %2462  ;;  %2470 = vrcp.f32 %v1378_v23  ;;  %v1435_v12 = vmul.f32 %v2461_v61, %v2931_v8 }
 0x16e   : > { %v1438_v9 = vmul.f32 %v2463_v36, %v2941_v57  ;;  %2472 = vrcp.f32 %v1376_v30 }
 0x16f   : > { %v2465_v10 = vpop.eup %2464 }
 0x170   : > { %v1988_v15 = vpack.c.bf16 %v1438_v9, %v1437_v1  ;;  %v1436_v16 = vmul.f32 %v2465_v10, %v2944_v60 }
 0x172   : > { %2012 = vst [vmem:[%s2875_s10 + $0x68] sm:$0xff] %v1988_v15   ;;  %v1983_v17 = vpack.c.bf16 %v1436_v16, %v1435_v12  ;;  %v2467_v14 = vpop.eup %2466 }
 0x173   : > { %v1441_v57 = vmul.f32 %v2467_v14, %v2951_v2 }
 0x174   : > { %2011 = vst [vmem:[%s2875_s10 + $0x60] sm:$0xff] %v1983_v17  }
 0x175   : > { %v2469_v32 = vpop.eup %2468 }
 0x176   : > { %v1439_v19 = vmul.f32 %v2469_v32, %v2959_v20 }
 0x177   : > { %v2471_v18 = vpop.eup %2470 }
 0x178   : > { %v2473_v53 = vpop.eup %2472  ;;  %v1442_v8 = vmul.f32 %v2471_v18, %v2962_v35 }
 0x179   : > { %v1440_v60 = vmul.f32 %v2473_v53, %v2965_v22 }
 0x17a   : > { %v1998_v21 = vpack.c.bf16 %v1442_v8, %v1441_v57 }
 0x17b   : > { %v1993_v6 = vpack.c.bf16 %v1440_v60, %v1439_v19 }
 0x17c   : > { %2014 = vst [vmem:[%s2875_s10 + $0x78] sm:$0xff] %v1998_v21  }
 0x17d   : > { %2013 = vst [vmem:[%s2875_s10 + $0x70] sm:$0xff] %v1993_v6  }
 0x17e   : > { %2487 = shalt.err (!%p2484_p5)
}
 0x17f   : > { %s2488_s30 = scalar_lea.hbm %s2997_s21, 2048  ;;  %s2492_s7 = scalar_lea.hbm %s3055_s4, 4096 }
 0x180   : > { %p2489_p6 = scmp.ne.s32.totalorder %s2997_s21, %s2488_s30  ;;  %p2493_p10 = scmp.lt.u32.totalorder %s2997_s21, %s3055_s4 }
 0x181   : > { %p2494_p11 = scmp.lt.u32.totalorder %s2492_s7, %s2488_s30  ;;  %p2496_p13 = scmp.lt.u32.totalorder %s2488_s30, %s2997_s21 }
 0x182   : > { %p2490_p7 = pnand %p2489_p6, %p2622_p4 }
 0x183   : > { %p2495_p12 = por %p2494_p11, %p2493_p10 }
 0x184   : > { %p2491_p9 = pneg %p2490_p7 }
 0x185   : > { %p2497_p0 = por %p2496_p13, %p2495_p12 }
 0x187   : > { %p2498_p1 = pnand %p2497_p0, %p2491_p9 }
 0x189   : > { %2501 = shalt.err (!%p2498_p1)
}
 0x18a   : > { %s2555_s10 = smov 64   ;;  %s2556_s11 = smov 4  }
 0x18b   : > { %2250 = dma.vmem_to_hbm [thread:$0]  (%p2622_p4), %s2999_s12, 2048, %s2997_s21, %s3005_s18, %s2555_s10, %s2555_s10, %s2556_s11  }
 0x18c PF: > { %p2256_p2 = scmp.ge.s32.totalorder %s2552_s20, 2  ;;  %s1635_s13 = sand.u32 1, %s2532_s15  }
 0x18d   : > { %s1636_s14 = scalar_lea.sflag [#allocation3], %s1635_s13 }
 0x18e   : > { %p2253_p3 = pnand %p2256_p2, %p2629_p8 }
 0x190   : > { %2527 = dma.done.wait (!%p2253_p3), %s1636_s14, 2048  }
 0x191   : > { %2529 = vsyncadd (!%p2253_p3), %s1636_s14, 4294965248  ;;  %s17_s20 = sadd.s32 1, %s2552_s20   ;;  %s3058_s15 = smov %s2536_s16 }
 0x192   : > { %p14_p5 = scmp.ge.s32.totalorder %s17_s20, 4   ;;  %s3059_s16 = smov %s2540_s17 }
 0x193   : > { %s3060_s17 = smov %s2635_s28  ;;  %s3061_s18 = smov %s2548_s19 }
 0x194   : > { %s3062_s19 = smov %s3064_s23  ;;  %16 = sbr.rel (!%p14_p5) target bundleno = 4 (0x4), region = 82 }
 0x19b   :  { %1641 = vsyncpa [#allocation3], 1 }
 0x19c   :  { %1643 = vsyncpa [#allocation3 + $0x1], 1 }

</bundles_post_ra>
